<compile_context>
chip_gen: v7x
topology: tpu7x:2x2x1
jax: 0.10.0
libtpu: 0.0.40
codegen_flags: <defaults>
</compile_context>

<pallas_src>
import jax
import jax.numpy as jnp
from jax.experimental import pallas as pl
from jax.experimental.pallas import tpu as pltpu

_LANES = 128
_SUBLANES = 8
_NUM_SPLITS = 2               # leading parallel axis: 2 TCs on v7x, serial elsewhere
_TARGET_BLOCK_ROWS = 8192     # 8192 * 128 * 4B = 4 MiB block (8 MiB double-buffered)


def _round_up(a, m):
    return (a + m - 1) // m * m


def _partial_sum_kernel(x_ref, o_ref, acc_ref):
    """Grid = (split, block). Accumulate an (8,128) vector partial sum per split."""
    j = pl.program_id(1)

    @pl.when(j == 0)
    def _():
        acc_ref[...] = jnp.zeros_like(acc_ref)

    # x_ref is a (TB, 128) lane-dense tile; fold TB into vreg-rows and add on
    # the VPU (no per-step cross-lane XLU reduce, no scalar RMW).
    x = x_ref[...]
    acc_ref[...] += jnp.sum(x.reshape(-1, _SUBLANES, _LANES), axis=0)

    @pl.when(j == pl.num_programs(1) - 1)
    def _():
        o_ref[...] = acc_ref[...].reshape(1, _SUBLANES, _LANES)


def mean_all_keepdim(x):
    """torch.ops.aten.mean(x, (0, 1, 2), keepdim=True) for 3-D float32 x."""
    d0, d1, d2 = x.shape
    n_total = d0 * d1 * d2

    # --- wrapper-side layout: flatten, zero-pad, reshape to (rows, 128) -----
    rows = pl.cdiv(n_total, _LANES)
    rows_per_split = _round_up(pl.cdiv(rows, _NUM_SPLITS), _SUBLANES)
    blocks_per_split = pl.cdiv(rows_per_split, _TARGET_BLOCK_ROWS)
    tb = _round_up(pl.cdiv(rows_per_split, blocks_per_split), _SUBLANES)
    padded_rows = _NUM_SPLITS * blocks_per_split * tb
    padded_n = padded_rows * _LANES

    xf = x.reshape(-1)
    if padded_n != n_total:
        # zero padding does not change the sum; we divide by the true n_total
        xf = jnp.pad(xf, (0, padded_n - n_total))
    x2d = xf.reshape(padded_rows, _LANES)

    partials = pl.pallas_call(
        _partial_sum_kernel,
        out_shape=jax.ShapeDtypeStruct((_NUM_SPLITS, _SUBLANES, _LANES), jnp.float32),
        grid_spec=pltpu.PrefetchScalarGridSpec(
            num_scalar_prefetch=0,
            grid=(_NUM_SPLITS, blocks_per_split),
            in_specs=[
                pl.BlockSpec(
                    (tb, _LANES),
                    lambda c, j: (c * blocks_per_split + j, 0),
                ),
            ],
            # one resident partial-sum slab per split (constant across the
            # reduction axis j, indexed by the parallel axis c)
            out_specs=pl.BlockSpec(
                (1, _SUBLANES, _LANES),
                lambda c, j: (c, 0, 0),
            ),
            scratch_shapes=[pltpu.VMEM((_SUBLANES, _LANES), jnp.float32)],
        ),
        compiler_params=pltpu.CompilerParams(
            dimension_semantics=("parallel", "arbitrary"),
            vmem_limit_bytes=32 * 1024 * 1024,
        ),
    )(x2d)

    # tiny epilogue: tree-style final reduce of 2*8*128 partials + 1/n scale
    mean = jnp.sum(partials) / n_total
    return mean.reshape(1, 1, 1).astype(x.dtype)


if __name__ == "__main__":
    key = jax.random.PRNGKey(0)
    # module signature: ([-1, -1, -1], torch.float32) -> any 3-D float32 tensor
    x = jax.random.normal(key, (4, 16, 32), dtype=jnp.float32)

    out = mean_all_keepdim(x)
    out = jax.block_until_ready(out)

    ref = jnp.mean(x, axis=(0, 1, 2), keepdims=True)
    assert out.shape == (1, 1, 1), out.shape
    assert jnp.allclose(out, ref, atol=1e-5, rtol=1e-5), (out, ref)
    print("KERNEL_OK")
</pallas_src>

<mosaic_0001>
module attributes {stable_mosaic.version = 11 : i64} {
  func.func @_partial_sum_kernel(%arg0: i32, %arg1: i32, %arg2: memref<8x128xf32, #tpu.memory_space<vmem>>, %arg3: memref<1x8x128xf32, #tpu.memory_space<vmem>>, %arg4: memref<8x128xf32, #tpu.memory_space<vmem>>) attributes {dimension_semantics = [#tpu.dimension_semantics<parallel>, #tpu.dimension_semantics<arbitrary>], iteration_bounds = array<i64: 2, 1>, scalar_prefetch = 0 : i64, scratch_operands = 1 : i64, tpu.core_type = #tpu.core_type<tc>, window_params = [{transform_indices = @transform_0, window_bounds = array<i64: 8, 128>}, {transform_indices = @transform_1, window_bounds = array<i64: 1, 8, 128>}]} {
    %c0_i32 = arith.constant 0 : i32
    %0 = arith.cmpi eq, %arg1, %c0_i32 : i32
    %1 = arith.extui %0 : i1 to i32
    %c0_i32_0 = arith.constant 0 : i32
    %2 = arith.cmpi ne, %1, %c0_i32_0 : i32
    scf.if %2 {
      %cst_8 = arith.constant 0.000000e+00 : f32
      %12 = vector.broadcast %cst_8 : f32 to vector<8x128xf32>
      %c0_9 = arith.constant 0 : index
      %c0_10 = arith.constant 0 : index
      %13 = vector.load %arg4[%c0_9, %c0_10] : memref<8x128xf32, #tpu.memory_space<vmem>>, vector<8x128xf32>
      tpu.vector_store %arg4[%c0_9, %c0_10], %12 {strides = array<i32>} : memref<8x128xf32, #tpu.memory_space<vmem>>, vector<8x128xf32>,
    } else {
    }
    %c0 = arith.constant 0 : index
    %c0_1 = arith.constant 0 : index
    %3 = vector.load %arg2[%c0, %c0_1] : memref<8x128xf32, #tpu.memory_space<vmem>>, vector<8x128xf32>
    %c0_2 = arith.constant 0 : index
    %c0_3 = arith.constant 0 : index
    %4 = vector.load %arg4[%c0_2, %c0_3] : memref<8x128xf32, #tpu.memory_space<vmem>>, vector<8x128xf32>
    %5 = vector.shape_cast %3 : vector<8x128xf32> to vector<1x8x128xf32>
    %cst = arith.constant dense<0.000000e+00> : vector<8x128xf32>
    %6 = vector.multi_reduction <add>, %5, %cst [0] : vector<1x8x128xf32> to vector<8x128xf32>
    %7 = arith.addf %4, %6 : vector<8x128xf32>
    %c0_4 = arith.constant 0 : index
    %c0_5 = arith.constant 0 : index
    %8 = vector.load %arg4[%c0_4, %c0_5] : memref<8x128xf32, #tpu.memory_space<vmem>>, vector<8x128xf32>
    tpu.vector_store %arg4[%c0_4, %c0_5], %7 {strides = array<i32>} : memref<8x128xf32, #tpu.memory_space<vmem>>, vector<8x128xf32>,
    %c0_i32_6 = arith.constant 0 : i32
    %9 = arith.cmpi eq, %arg1, %c0_i32_6 : i32
    %10 = arith.extui %9 : i1 to i32
    %c0_i32_7 = arith.constant 0 : i32
    %11 = arith.cmpi ne, %10, %c0_i32_7 : i32
    scf.if %11 {
      %c0_8 = arith.constant 0 : index
      %c0_9 = arith.constant 0 : index
      %12 = vector.load %arg4[%c0_8, %c0_9] : memref<8x128xf32, #tpu.memory_space<vmem>>, vector<8x128xf32>
      %13 = vector.shape_cast %12 : vector<8x128xf32> to vector<1x8x128xf32>
      %c0_10 = arith.constant 0 : index
      %c0_11 = arith.constant 0 : index
      %c0_12 = arith.constant 0 : index
      %14 = vector.load %arg3[%c0_10, %c0_11, %c0_12] : memref<1x8x128xf32, #tpu.memory_space<vmem>>, vector<1x8x128xf32>
      tpu.vector_store %arg3[%c0_10, %c0_11, %c0_12], %13 {strides = array<i32>} : memref<1x8x128xf32, #tpu.memory_space<vmem>>, vector<1x8x128xf32>,
    } else {
    }
    return
  }
  func.func @transform_0(%arg0: i32, %arg1: i32) -> (i32, i32) {
    %c1_i32 = arith.constant 1 : i32
    %0 = arith.muli %arg0, %c1_i32 : i32
    %1 = arith.addi %0, %arg1 : i32
    %c0_i32 = arith.constant 0 : i32
    %c0_i32_0 = arith.constant 0 : i32
    return %1, %c0_i32 : i32, i32
  }
  func.func @transform_1(%arg0: i32, %arg1: i32) -> (i32, i32, i32) {
    %c0_i32 = arith.constant 0 : i32
    %c0_i32_0 = arith.constant 0 : i32
    %c0_i32_1 = arith.constant 0 : i32
    return %arg0, %c0_i32, %c0_i32_0 : i32, i32, i32
  }
}

</mosaic_0001>

<bundles_post_ra>
// kernel: tpu_custom_call.1
= control target key start
LH: loop header
LB: loop body
LE: loop exit
PB: predicated region body
PF: predicated region fallthrough
CT: control target
= control target key end

     0   :  { %6 = vsyncpa [#allocation4], 0  ;;  %s629_s0 = inlined_call_operand.hbm [shape: f32[16,128], index: 0, kind: input, shape index: {}]   ;;  %s630_s1 = inlined_call_operand.hbm [shape: f32[2,8,128], index: 1, kind: output, shape index: {}]  }
   0x1   :  { %8 = vsyncpa [#allocation4 + $0x1], 0 }
   0x2   :  { %9 = vsyncpa [#allocation5], 0 }
   0x3   :  { %11 = vsyncpa [#allocation5 + $0x1], 0  ;;  %s457_s6 = smov 0   ;;  %s459_s7 = smov 0  }
   0x4   :  { %s461_s8 = smov 0   ;;  %s463_s9 = smov 0  }
   0x5   :  { %s465_s10 = smov 0   ;;  %s467_s11 = smov 0  }
   0x6 LB: > { %s256_s12 = sadd.s32 4294967295, %s443_s11   ;;  %s257_s13 = sadd.s32 4294967294, %s443_s11   ;;  %s443_s11 = sphi %s467_s11, %s17_s11   ;;  %s439_s10 = sphi %s465_s10, %s646_s10   ;;  %s435_s9 = sphi %s463_s9, %s645_s9   ;;  %s431_s8 = sphi %s461_s8, %s644_s8   ;;  %s427_s7 = sphi %s459_s7, %s643_s7   ;;  %s423_s6 = sphi %s457_s6, %s642_s6  }
   0x7   : > { %s29_s14 = sadd.s32 1, %s439_s10  ;;  %s38_s15 = sadd.s32 1, %s431_s8 }
   0x8   : > { %p31_p0 = scmp.ge.s32.totalorder %s29_s14, 2  ;;  %p45_p1 = scmp.ne.s32.totalorder %s431_s8, %s427_s7 }
   0x9   : > { %p46_p2 = scmp.eq.s32.totalorder %s443_s11, 0  ;;  %p51_p3 = scmp.ne.s32.totalorder %s427_s7, %s423_s6 }
   0xa   : > { %s648_s14 = smov (%p31_p0, %s29_s14), 0  ;;  %p52_p5 = scmp.eq.s32.totalorder %s256_s12, 0 }
   0xb   : > { %p498_p4 = por %p46_p2, %p45_p1  ;;  %s35_s17 = ssub.s32 %s439_s10, %s648_s14 }
   0xc   : > { %p75_p6 = scmp.eq.s32.totalorder %s256_s12, 1  ;;  %p36_p7 = scmp.eq.s32.totalorder %s35_s17, 0 }
   0xd   : > { %p504_p8 = por %p52_p5, %p51_p3  ;;  %p81_p10 = scmp.eq.s32.totalorder %s257_s13, 1 }
   0xe   : > { %p508_p9 = por %p75_p6, %p45_p1  ;;  %p281_p13 = scmp.lt.s32.totalorder %s443_s11, 2 }
   0xf   : > { %s513_s20 = scalar_select %p36_p7, %s431_s8, %s38_s15  }
  0x10   : > { %s634_s19 = scalar_select %p508_p9, 1, 0 }
  0x11   : > { %p515_p11 = por %p81_p10, %p51_p3  ;;  %s101_s22 = sand.u32 1, %s431_s8  }
  0x12   : > { %s260_s23 = sshll.u32 %s101_s22, 3  ;;  %s261_s24 = sshll.u32 %s439_s10, 7 }
  0x13   : > { %s635_s21 = scalar_select %p515_p11, 1, 0 }
  0x14   : > { %s526_s27 = scalar_lea.hbm %s629_s0, %s261_s24  ;;  %s105_s28 = scalar_lea.vmem [#allocation3], %s260_s23 }
  0x15   : > { %s113_s29 = sshll.u32 %s105_s28, 4  ;;  %p532_p0 = pnand %p281_p13, %p498_p4  ;;  %s528_s29 = int_to_ptr.vmem [resolvable:$true] %s113_s29 }
  0x16   : > { %s102_s2 = scalar_lea.sflag [#allocation4], %s101_s22  ;;  %s331_s3 = scalar_lea.hbm %s526_s27, 128 }
  0x17   : > { %p332_p3 = scmp.ne.s32.totalorder %s526_s27, %s331_s3  ;;  %p333_p5 = pneg %p532_p0 }
  0x18   : > { %s336_s12 = scalar_lea.hbm %s629_s0, 256  ;;  %p337_p4 = scmp.lt.u32.totalorder %s526_s27, %s629_s0 }
  0x19   : > { %p334_p6 = pnand %p333_p5, %p332_p3  ;;  %p338_p10 = scmp.lt.u32.totalorder %s336_s12, %s331_s3 }
  0x1a   : > { %p340_p12 = scmp.lt.u32.totalorder %s331_s3, %s526_s27 }
  0x1b   : > { %p335_p7 = pneg %p334_p6  ;;  %p339_p13 = por %p338_p10, %p337_p4 }
  0x1d   : > { %p341_p1 = por %p340_p12, %p339_p13 }
  0x1f   : > { %p342_p2 = pnand %p341_p1, %p335_p7 }
  0x21   : > { %345 = shalt.err (!%p342_p2)
}
  0x22   : > { %s346_s16 = scalar_lea.vmem %s528_s29, 128  ;;  %s445_s17 = smov [#allocation3]  }
  0x23   : > { %p347_p3 = scmp.ne.s32.totalorder %s528_s29, %s346_s16  ;;  %s351_s22 = sshll.u32 %s445_s17, 4  ;;  %s352_s22 = int_to_ptr.vmem [resolvable:$false] %s351_s22 }
  0x24   : > { %s353_s23 = scalar_lea.vmem %s352_s22, 256  ;;  %p354_p9 = scmp.lt.s32.totalorder %s528_s29, %s352_s22 }
  0x25   : > { %p349_p6 = pnand %p347_p3, %p333_p5  ;;  %p355_p4 = scmp.lt.s32.totalorder %s353_s23, %s346_s16 }
  0x27   : > { %p350_p11 = pneg %p349_p6  ;;  %p356_p10 = por %p355_p4, %p354_p9 }
  0x29   : > { %p357_p12 = pnand %p356_p10, %p350_p11 }
  0x2b   : > { %360 = shalt.err (!%p357_p12)
}
  0x2c   : > { %276 = dma.hbm_to_vmem [thread:$0]  (!%p532_p0), %s526_s27, 128, %s528_s29, %s102_s2  }
  0x2d   : > { %p637_p1 = scmp.lt.s32.totalorder %s443_s11, 3  ;;  %p638_p2 = scmp.ge.s32.totalorder %s443_s11, 1 }
  0x2f   : > { %p119_p5 = pnand %p638_p2, %p637_p1 }
  0x30   : > { %s568_s24 = sand.u32 (!%p119_p5), 1, %s427_s7  }
  0x31   : > { %122 = sbr.rel (%p119_p5) target bundleno = 83 (0x53), region = 24  ;;  %s263_s25 = sshll.u32 (!%p119_p5), %s568_s24, 3 }
  0x32   : > { %s125_s26 = scalar_lea.sflag (!%p119_p5), [#allocation4], %s568_s24  ;;  %s128_s28 = scalar_lea.vmem (!%p119_p5), [#allocation3], %s263_s25 }
  0x38   : > { %414 = dma.done.wait (%p504_p8), %s125_s26, 128  }
  0x39   : > { %416 = vsyncadd (%p504_p8), %s125_s26, 4294967168  ;;  %s146_s27 = scalar_lea.vmem [#allocation6], %s263_s25  ;;  %s266_s30 = sshll.u32 %s435_s9, 7  ;;  %v153_v0 = vld [vmem:[%s128_s28] sm:$0xff] }
  0x3a   : > { %s177_s29 = sshll.u32 %s146_s27, 4  ;;  %s582_s4 = scalar_lea.hbm %s630_s1, %s266_s30  ;;  %162 = vst [vmem:[%s146_s27] sm:$0xff] %v153_v0  ;;  %s577_s29 = int_to_ptr.vmem [resolvable:$true] %s177_s29 }
  0x3b   : > { %s164_s18 = scalar_lea.sflag [#allocation5], %s568_s24  ;;  %s361_s5 = scalar_lea.vmem %s577_s29, 128 }
  0x3c   : > { %p362_p8 = scmp.ne.s32.totalorder %s577_s29, %s361_s5  ;;  %p639_p9 = scmp.ne.s32.totalorder %s634_s19, 0 }
  0x3d   : > { %s446_s12 = smov [#allocation6]  }
  0x3e   : > { %p363_p11 = pnand %p362_p8, %p639_p9  ;;  %s365_s9 = sshll.u32 %s446_s12, 4  ;;  %s366_s9 = int_to_ptr.vmem [resolvable:$false] %s365_s9 }
  0x3f   : > { %s367_s13 = scalar_lea.vmem %s366_s9, 256  ;;  %p368_p7 = scmp.lt.s32.totalorder %s577_s29, %s366_s9 }
  0x40   : > { %p364_p0 = pneg %p363_p11  ;;  %p369_p13 = scmp.lt.s32.totalorder %s367_s13, %s361_s5 }
  0x42   : > { %p370_p3 = por %p369_p13, %p368_p7 }
  0x44   : > { %p371_p6 = pnand %p370_p3, %p364_p0 }
  0x46   : > { %374 = shalt.err (!%p371_p6)
}
  0x47   : > { %s375_s15 = scalar_lea.hbm %s582_s4, 128  ;;  %s379_s22 = scalar_lea.hbm %s630_s1, 256 }
  0x48   : > { %p376_p4 = scmp.ne.s32.totalorder %s582_s4, %s375_s15  ;;  %p380_p1 = scmp.lt.u32.totalorder %s582_s4, %s630_s1 }
  0x49   : > { %p381_p2 = scmp.lt.u32.totalorder %s379_s22, %s375_s15  ;;  %p383_p8 = scmp.lt.u32.totalorder %s375_s15, %s582_s4 }
  0x4a   : > { %p377_p10 = pnand %p376_p4, %p639_p9 }
  0x4b   : > { %p382_p5 = por %p381_p2, %p380_p1 }
  0x4c   : > { %p378_p12 = pneg %p377_p10 }
  0x4d   : > { %p384_p11 = por %p383_p8, %p382_p5 }
  0x4f   : > { %p385_p0 = pnand %p384_p11, %p378_p12 }
  0x51   : > { %388 = shalt.err (!%p385_p0)
}
  0x52   : > { %271 = dma.vmem_to_hbm [thread:$0]  (%p639_p9), %s577_s29, 128, %s582_s4, %s164_s18  }
  0x53 PF: > { %s189_s25 = sand.u32 1, %s423_s6   ;;  %p640_p7 = scmp.ne.s32.totalorder %s635_s21, 0 }
  0x54   : > { %p641_p13 = scmp.ge.s32.totalorder %s443_s11, 2  ;;  %s190_s26 = scalar_lea.sflag [#allocation5], %s189_s25 }
  0x56   : > { %p278_p3 = pnand %p641_p13, %p640_p7 }
  0x58   : > { %418 = dma.done.wait (!%p278_p3), %s190_s26, 128  }
  0x59   : > { %420 = vsyncadd (!%p278_p3), %s190_s26, 4294967168  ;;  %s17_s11 = sadd.s32 1, %s443_s11   ;;  %s642_s6 = smov %s427_s7 }
  0x5a   : > { %p14_p6 = scmp.ge.s32.totalorder %s17_s11, 4   ;;  %s643_s7 = smov %s431_s8 }
  0x5b   : > { %s644_s8 = smov %s513_s20  ;;  %s645_s9 = smov %s439_s10 }
  0x5c   : > { %s646_s10 = smov %s648_s14  ;;  %16 = sbr.rel (!%p14_p6) target bundleno = 6 (0x6), region = 77 }
  0x63   :  { %195 = vsyncpa [#allocation4], 1 }
  0x64   :  { %197 = vsyncpa [#allocation4 + $0x1], 1 }
  0x65   :  { %198 = vsyncpa [#allocation5], 1 }
  0x66   :  { %200 = vsyncpa [#allocation5 + $0x1], 1 }

</bundles_post_ra>
